<compile_context>
chip_gen: v7x
topology: tpu7x:2x2x1
jax: 0.10.0
libtpu: 0.0.40
codegen_flags: <defaults>
</compile_context>

<pallas_src>
import jax
import jax.numpy as jnp
from jax import lax
from jax.experimental import pallas as pl
from jax.experimental.pallas import tpu as pltpu


_LANE = 128
_SUBLANE = 8
_TILE = 512              # base tile edge for the wide-OUT GEMM path (safe on v5e/v6e/v7x)
_SMALL_OUT = 128         # below this, put the batch on the 128-lane axis instead of OUT
_MAX_BATCH_TILE = 8192   # upper bound for the lane-dense batch tile
_VMEM_BUDGET = 10 << 20  # budget for double-buffered x + resident y^T (v5e-default safe)


def _cdiv(a, b):
    return -(-a // b)


def _round_up(x, m):
    return _cdiv(x, m) * m


def _tile_dim(dim, max_tile, align):
    """Single full-extent block when it fits (exempt from the (8,128) rule);
    otherwise `align`-multiple tiles sized to minimize ragged waste."""
    if dim <= max_tile:
        return dim, 1
    n = _cdiv(dim, max_tile)
    tile = min(max_tile, _round_up(_cdiv(dim, n), align))
    n = _cdiv(dim, tile)
    return tile, n


def _lane_dense_batch_tile(B, k_cols, out_rows, itemsize):
    """Batch tile for the lane-dense path: big DMAs, bounded VMEM, >=2 blocks
    for large B (so both v7x TensorCores get work), no padding for small B."""
    bytes_per_row = 2 * k_cols * itemsize + out_rows * 4   # dbl-buffered x + resident y^T
    cap = max(_LANE, min(_MAX_BATCH_TILE,
                         (_VMEM_BUDGET // bytes_per_row) // _LANE * _LANE))
    if B < 2 * _LANE:
        return B, 1                       # single full-extent block: zero padding/raggedness
    nb = max(2, _cdiv(B, cap))
    tb = min(cap, _round_up(_cdiv(B, nb), _LANE))
    nb = _cdiv(B, tb)
    return tb, nb


def _prepare_k(x, w):
    """Pad the contracted axis only when it must be tiled (IN > _TILE)."""
    IN = x.shape[1]
    if IN <= _TILE:
        return x, w, IN, 1
    Kp = _round_up(IN, _TILE)
    if Kp != IN:
        x = jnp.pad(x, ((0, 0), (0, Kp - IN)))
        w = jnp.pad(w, ((0, 0), (0, Kp - IN)))
    return x, w, _TILE, Kp // _TILE


# ----------------------------------------------------------------------------
# Kernels
# ----------------------------------------------------------------------------
def _lane_dense_k1_kernel(x_ref, w_ref, b_ref, o_ref):
    """y^T(OUT, tb) = W(OUT, K) . x(tb, K)^T + b -- single K block, no accumulator."""
    o_ref[...] = (
        lax.dot_general(
            w_ref[...], x_ref[...],
            dimension_numbers=(((1,), (1,)), ((), ())),
            preferred_element_type=jnp.float32,
        )
        + b_ref[...]
    ).astype(o_ref.dtype)


def _lane_dense_ktiled_kernel(x_ref, w_ref, b_ref, o_ref):
    """y^T(OUT, tb) accumulated directly in the resident f32 output block."""
    k = pl.program_id(1)

    @pl.when(k == 0)
    def _():
        o_ref[...] = jnp.broadcast_to(b_ref[...].astype(jnp.float32), o_ref.shape)

    o_ref[...] += lax.dot_general(
        w_ref[...], x_ref[...],
        dimension_numbers=(((1,), (1,)), ((), ())),
        preferred_element_type=jnp.float32,
    )


def _general_k1_kernel(x_ref, w_ref, b_ref, o_ref):
    """y(tm, tn) = x(tm, K) . W(tn, K)^T + b -- single K block, no accumulator."""
    o_ref[...] = (
        lax.dot_general(
            x_ref[...], w_ref[...],
            dimension_numbers=(((1,), (1,)), ((), ())),
            preferred_element_type=jnp.float32,
        )
        + b_ref[...]
    ).astype(o_ref.dtype)


def _general_ktiled_kernel(x_ref, w_ref, b_ref, o_ref):
    """y(tm, tn) accumulated directly in the resident f32 output block."""
    k = pl.program_id(2)

    @pl.when(k == 0)
    def _():
        o_ref[...] = jnp.broadcast_to(b_ref[...].astype(jnp.float32), o_ref.shape)

    o_ref[...] += lax.dot_general(
        x_ref[...], w_ref[...],
        dimension_numbers=(((1,), (1,)), ((), ())),
        preferred_element_type=jnp.float32,
    )


# ----------------------------------------------------------------------------
# Wrapper
# ----------------------------------------------------------------------------
def linear_model_forward(x, weight, bias, *, use_bf16_inputs=False):
    """FairICP linear_model.forward.

    x: (B, in), weight: (out, in) [native PyTorch layout, never transposed on
    the host], bias: (out,).  Returns squeeze(x @ W^T + b).
    `use_bf16_inputs=True` runs the MXU in bf16 (f32 accumulation) -- faster on
    every TPU generation but numerics differ slightly from fp32, so it is off
    by default.
    """
    if x.ndim == 1:
        x = x[None, :]
    B, IN = x.shape
    OUT = weight.shape[0]
    out_dtype = x.dtype

    if use_bf16_inputs:
        x = x.astype(jnp.bfloat16)
        weight = weight.astype(jnp.bfloat16)

    xk, wk, tk, nk = _prepare_k(x, weight)
    ktiled = nk > 1
    itemsize = jnp.dtype(xk.dtype).itemsize
    Kp = tk * nk

    if OUT < _SMALL_OUT:
        # ---------------- lane-dense path: y^T = W @ x^T ---------------------
        tb, nb = _lane_dense_batch_tile(B, tk, OUT, itemsize)
        b2 = bias.reshape(OUT, 1)
        res_dtype = jnp.float32 if ktiled else out_dtype

        cost = pl.CostEstimate(
            flops=2 * B * IN * OUT,
            transcendentals=0,
            bytes_accessed=int(itemsize * (B * Kp + nb * OUT * Kp)
                               + 4 * OUT + 4 * B * OUT),
        )

        if ktiled:
            kern = _lane_dense_ktiled_kernel
            grid = (nb, nk)
            in_specs = [
                pl.BlockSpec((tb, tk), lambda i, k: (i, k)),     # x
                pl.BlockSpec((OUT, tk), lambda i, k: (0, k)),    # W, native (out, in)
                pl.BlockSpec((OUT, 1), lambda i, k: (0, 0)),     # bias
            ]
            out_spec = pl.BlockSpec((OUT, tb), lambda i, k: (0, i))
            sems = ("parallel", "arbitrary")
        else:
            kern = _lane_dense_k1_kernel
            grid = (nb,)
            in_specs = [
                pl.BlockSpec((tb, tk), lambda i: (i, 0)),
                pl.BlockSpec((OUT, tk), lambda i: (0, 0)),
                pl.BlockSpec((OUT, 1), lambda i: (0, 0)),
            ]
            out_spec = pl.BlockSpec((OUT, tb), lambda i: (0, i))
            sems = ("parallel",)

        yt = pl.pallas_call(
            kern,
            out_shape=jax.ShapeDtypeStruct((OUT, B), res_dtype),  # unpadded: ragged edge masked
            grid=grid,
            in_specs=in_specs,
            out_specs=out_spec,
            compiler_params=pltpu.CompilerParams(dimension_semantics=sems),
            cost_estimate=cost,
        )(xk, wk, b2)

        y = yt.T.astype(out_dtype)            # tiny (OUT x B) glue transpose back to (B, OUT)
    else:
        # ---------------- wide-OUT tiled GEMM path: y = x @ W^T --------------
        tm, nm = _tile_dim(B, _TILE, _SUBLANE)
        tn, nn = _tile_dim(OUT, _TILE, _LANE)
        b2 = bias.reshape(1, OUT)
        res_dtype = jnp.float32 if ktiled else out_dtype

        cost = pl.CostEstimate(
            flops=2 * B * IN * OUT,
            transcendentals=0,
            bytes_accessed=int(itemsize * (nn * B * Kp + nm * OUT * Kp)
                               + 4 * OUT + 4 * B * OUT),
        )

        if ktiled:
            kern = _general_ktiled_kernel
            grid = (nm, nn, nk)
            in_specs = [
                pl.BlockSpec((tm, tk), lambda i, j, k: (i, k)),   # x
                pl.BlockSpec((tn, tk), lambda i, j, k: (j, k)),   # W, native (out, in)
                pl.BlockSpec((1, tn), lambda i, j, k: (0, j)),    # bias
            ]
            out_spec = pl.BlockSpec((tm, tn), lambda i, j, k: (i, j))
            sems = ("parallel", "parallel", "arbitrary")
        else:
            kern = _general_k1_kernel
            grid = (nm, nn)
            in_specs = [
                pl.BlockSpec((tm, tk), lambda i, j: (i, 0)),
                pl.BlockSpec((tn, tk), lambda i, j: (j, 0)),
                pl.BlockSpec((1, tn), lambda i, j: (0, j)),
            ]
            out_spec = pl.BlockSpec((tm, tn), lambda i, j: (i, j))
            sems = ("parallel", "parallel")

        yp = pl.pallas_call(
            kern,
            out_shape=jax.ShapeDtypeStruct((B, OUT), res_dtype),  # unpadded: ragged edge masked
            grid=grid,
            in_specs=in_specs,
            out_specs=out_spec,
            compiler_params=pltpu.CompilerParams(dimension_semantics=sems),
            cost_estimate=cost,
        )(xk, wk, b2)

        y = yp.astype(out_dtype)

    # torch.squeeze drops every size-1 dim (e.g. out_shape == 1 -> (B,))
    return jnp.squeeze(y)


if __name__ == "__main__":
    key = jax.random.PRNGKey(0)

    def make_case(k, B, IN, OUT):
        kx, kw, kb = jax.random.split(k, 3)
        bound = 1.0 / (IN ** 0.5)  # PyTorch nn.Linear default init range
        w = jax.random.uniform(kw, (OUT, IN), jnp.float32, -bound, bound)
        b = jax.random.uniform(kb, (OUT,), jnp.float32, -bound, bound)
        xx = jax.random.normal(kx, (B, IN), jnp.float32)
        return xx, w, b

    keys = jax.random.split(key, 5)
    cases = [
        make_case(keys[0], 8, 4, 2),       # module-like shapes: lane-dense, single block
        make_case(keys[1], 600, 4, 1),     # lane-dense, ragged batch tiles, no host padding
        make_case(keys[2], 8, 4, 256),     # wide-OUT path, single K block
        make_case(keys[3], 40, 1100, 2),   # lane-dense, K-tiled (accumulate into o_ref)
        make_case(keys[4], 16, 640, 200),  # wide-OUT path, K-tiled
    ]

    for x, w, b in cases:
        out = jax.block_until_ready(linear_model_forward(x, w, b))
        ref = jnp.squeeze(x @ w.T + b)
        assert out.shape == ref.shape, (out.shape, ref.shape)
        assert jnp.allclose(out, ref, atol=2e-5, rtol=2e-5), \
            float(jnp.max(jnp.abs(out - ref)))

    print("KERNEL_OK")
</pallas_src>

<mosaic_0001>
module attributes {stable_mosaic.version = 11 : i64} {
  func.func @_lane_dense_k1_kernel(%arg0: i32, %arg1: memref<8x4xf32, #tpu.memory_space<vmem>>, %arg2: memref<2x4xf32, #tpu.memory_space<vmem>>, %arg3: memref<2x1xf32, #tpu.memory_space<vmem>>, %arg4: memref<2x8xf32, #tpu.memory_space<vmem>>) attributes {dimension_semantics = [#tpu.dimension_semantics<parallel>], iteration_bounds = array<i64: 1>, scalar_prefetch = 0 : i64, scratch_operands = 0 : i64, tpu.core_type = #tpu.core_type<tc>, window_params = [{transform_indices = @transform_0, window_bounds = array<i64: 8, 4>}, {pipeline_mode = #tpu.pipeline_mode<synchronous>, transform_indices = @transform_1, window_bounds = array<i64: 2, 4>}, {pipeline_mode = #tpu.pipeline_mode<synchronous>, transform_indices = @transform_2, window_bounds = array<i64: 2, 1>}, {transform_indices = @transform_3, window_bounds = array<i64: 2, 8>}]} {
    %c0 = arith.constant 0 : index
    %c0_0 = arith.constant 0 : index
    %0 = vector.load %arg2[%c0, %c0_0] : memref<2x4xf32, #tpu.memory_space<vmem>>, vector<2x4xf32>
    %c0_1 = arith.constant 0 : index
    %c0_2 = arith.constant 0 : index
    %1 = vector.load %arg1[%c0_1, %c0_2] : memref<8x4xf32, #tpu.memory_space<vmem>>, vector<8x4xf32>
    %cst = arith.constant dense<0.000000e+00> : vector<2x8xf32>
    %2 = tpu.matmul %0, %1, %cst {dimension_numbers = #tpu.dot_dimension_numbers<[1], [1], [0], [0], [0, 0, 1, 0], [], []>} : vector<2x4xf32>, vector<8x4xf32>, vector<2x8xf32> -> vector<2x8xf32>
    %c0_3 = arith.constant 0 : index
    %c0_4 = arith.constant 0 : index
    %3 = vector.load %arg3[%c0_3, %c0_4] : memref<2x1xf32, #tpu.memory_space<vmem>>, vector<2x1xf32>
    %4 = vector.broadcast %3 : vector<2x1xf32> to vector<2x8xf32>
    %5 = arith.addf %2, %4 : vector<2x8xf32>
    %c0_5 = arith.constant 0 : index
    %c0_6 = arith.constant 0 : index
    %6 = vector.load %arg4[%c0_5, %c0_6] : memref<2x8xf32, #tpu.memory_space<vmem>>, vector<2x8xf32>
    tpu.vector_store %arg4[%c0_5, %c0_6], %5 {strides = array<i32>} : memref<2x8xf32, #tpu.memory_space<vmem>>, vector<2x8xf32>,
    return
  }
  func.func @transform_0(%arg0: i32) -> (i32, i32) {
    %c0_i32 = arith.constant 0 : i32
    %c0_i32_0 = arith.constant 0 : i32
    return %arg0, %c0_i32 : i32, i32
  }
  func.func @transform_1(%arg0: i32) -> (i32, i32) {
    %c0_i32 = arith.constant 0 : i32
    %c0_i32_0 = arith.constant 0 : i32
    %c0_i32_1 = arith.constant 0 : i32
    return %c0_i32, %c0_i32_0 : i32, i32
  }
  func.func @transform_2(%arg0: i32) -> (i32, i32) {
    %c0_i32 = arith.constant 0 : i32
    %c0_i32_0 = arith.constant 0 : i32
    %c0_i32_1 = arith.constant 0 : i32
    return %c0_i32, %c0_i32_0 : i32, i32
  }
  func.func @transform_3(%arg0: i32) -> (i32, i32) {
    %c0_i32 = arith.constant 0 : i32
    %c0_i32_0 = arith.constant 0 : i32
    return %c0_i32, %arg0 : i32, i32
  }
}

</mosaic_0001>

<bundles_post_ra>
// kernel: tpu_custom_call.1
= control target key start
LH: loop header
LB: loop body
LE: loop exit
PB: predicated region body
PF: predicated region fallthrough
CT: control target
= control target key end

     0   :  { %vm23_vm0 = vcmask 31744   ;;  %v154_v1 = vmov 0.0   ;;  %vm155_vm1 = vmmov 0   ;;  %s199_s0 = inlined_call_operand.vmem [shape: f32[8,4], index: 0, kind: input, shape index: {}]   ;;  %s200_s1 = inlined_call_operand.vmem [shape: f32[2,4], index: 1, kind: input, shape index: {}]   ;;  %s201_s2 = inlined_call_operand.vmem [shape: f32[2,1], index: 2, kind: input, shape index: {}]   ;;  %s202_s3 = inlined_call_operand.hbm [shape: f32[2,8], index: 3, kind: output, shape index: {}]  }
   0x1   :  { %v16_v0 = vld [vmem:[%s199_s0] sm:$0xff]  ;;  %120 = vmatprep.subr.mxu0 %v154_v1  ;;  %122 = vmatprep.mubr.msk.f32.mxu0 %vm155_vm1, %v154_v1 }
   0x2   :  { %v17_v2 = vld [vmem:[%s201_s2] sm:$0x3] }
   0x3   :  { %8 = vsyncpa [#allocation3], 0  ;;  %121 = vmatpush3.xpose.msk.msra.mxu0 %vm23_vm0, %v16_v0  ;;  %v15_v3 = vld [vmem:[%s200_s1] sm:$0x3]  ;;  %v156_v4 = vmov 0   ;;  %s157_s0 = smov [#allocation2]  }
   0x4   :  { %129 = vset.pattern.permute.xlu0 %v156_v4  ;;  %s108_s18 = sshll.u32 %s157_s0, 4  ;;  %vm100_vm2 = vcmask 58368   ;;  %s109_s18 = int_to_ptr.vmem [resolvable:$true] %s108_s18 }
   0x5   :  { %20 = vperm.xlu0 %129, %v17_v2   ;;  %s130_s2 = scalar_lea.vmem %s109_s18, 32  ;;  %p135_p1 = scmp.lt.s32.totalorder %s109_s18, %s109_s18 }
   0x6   :  { %123 = vmatmul.mubr.msk.f32.vlgmr.msra.gmra.mrb[0].mxu0 %vm23_vm0, %v15_v3  ;;  %p131_p0 = scmp.ne.s32.totalorder %s109_s18, %s130_s2  ;;  %p136_p2 = scmp.lt.s32.totalorder %s130_s2, %s130_s2 }
   0x8   :  { %p137_p3 = por %p136_p2, %p135_p1 }
   0xa   :  { %p138_p4 = pnand %p137_p3, %p131_p0 }
  0x84   :  { %v21_v5 = vpop.permute.xlu0 %20 }
  0xd9   :  { %v96_v6 = vpop.f32.mrb[0].mxu0 }
  0xda   :  { %v97_v7 = vadd.f32 %v96_v6, %v21_v5  ;;  %v124_v8 = vpop.f32.mrb[1].mxu0 }
  0xdc   :  { %101 = vst.msk [vmem:[#allocation2] sm:$0x3] %vm100_vm2, %v97_v7 }
  0xdd   :  { %141 = shalt.err (!%p138_p4)
}
  0xde   :  { %s142_s20 = scalar_lea.hbm %s202_s3, 32 }
  0xdf   :  { %p143_p5 = scmp.ne.s32.totalorder %s202_s3, %s142_s20  ;;  %p146_p6 = scmp.lt.u32.totalorder %s142_s20, %s202_s3 }
  0xe1   :  { %p148_p7 = pnand %p146_p6, %p143_p5 }
  0xe3   :  { %151 = shalt.err (!%p148_p7)
}
  0xe4   :  { %111 = dma.vmem_to_hbm [thread:$0]  %s109_s18, 32, %s202_s3, [#allocation3]  }
  0xe5   :  { %152 = dma.done.wait [#allocation3], 32  }
  0xe6   :  { %153 = vsyncadd [#allocation3], 4294967264 }
  0xe7   :  { %115 = vsyncpa [#allocation3], 1 }

</bundles_post_ra>
